<compile_context>
chip_gen: v5e
topology: v5e:2x2
jax: 0.10.0
libtpu: 0.0.40
codegen_flags: <defaults>
</compile_context>

<pallas_src>
from collections import namedtuple

import numpy as np
import jax
import jax.numpy as jnp
from jax.experimental import pallas as pl
from jax.experimental.pallas import tpu as pltpu

MeanAndVar = namedtuple("MeanAndVar", ("mean", "var"))
PALS_output = namedtuple("PALS_output", ("normal", "softmax"))
PreparedParams = namedtuple("PreparedParams", ("w1", "b1", "w2", "b2", "w3", "b3", "splits"))

_SOFTPLUS_BETA = 10.0
_SOFTPLUS_THRESHOLD = 20.0   # torch.nn.Softplus default threshold
_LANE = 128


def _round_up(n, m):
    return (n + m - 1) // m * m


def _pad_lanes(n):
    return max(_round_up(n, _LANE), _LANE)


def _softplus(x, beta=_SOFTPLUS_BETA, threshold=_SOFTPLUS_THRESHOLD):
    """torch.nn.Softplus(beta) semantics: linear once beta*x > threshold. Stable form."""
    bx = beta * x
    sp = (jnp.maximum(bx, 0.0) + jnp.log(1.0 + jnp.exp(-jnp.abs(bx)))) / beta
    return jnp.where(bx > threshold, x, sp)


# ----------------------------- Pallas kernel -------------------------------- #

def _make_pals_gnll_kernel(n_norm, n_nvar, n_soft, n_svar, op_dtype,
                           beta=_SOFTPLUS_BETA, threshold=_SOFTPLUS_THRESHOLD):
    """Fused 3-layer MLP + heads. Output columns (already permuted host-side) are
    contiguous groups: [normal mean | normal var | softmax | softmax var]."""
    s1 = n_norm
    s2 = s1 + n_nvar
    s3 = s2 + n_soft
    d_out = s3 + n_svar
    has_var = (n_nvar + n_svar) > 0
    has_soft = n_soft > 0

    def kernel(x_ref, w1_ref, b1_ref, w2_ref, b2_ref, w3_ref, b3_ref, o_ref):
        x = x_ref[...]
        # MXU matmuls in op_dtype (bf16 by default), f32 accumulation; epilogue all f32.
        h1 = jnp.dot(x, w1_ref[...], preferred_element_type=jnp.float32) + b1_ref[...]
        h1 = jnp.maximum(h1, 0.0)                                   # ReLU (activation[0])
        h2 = jnp.dot(h1.astype(op_dtype), w2_ref[...],
                     preferred_element_type=jnp.float32) + b2_ref[...]
        h2 = jnp.maximum(h2, 0.0)                                   # ReLU (activation[1])
        y = jnp.dot(h2.astype(op_dtype), w3_ref[...],
                    preferred_element_type=jnp.float32) + b3_ref[...]

        out = y
        # Hoisted (1, d_out) column masks; broadcast happens inside jnp.where.
        col = jax.lax.broadcasted_iota(jnp.int32, (1, d_out), 1)

        if has_var:
            is_var = ((col >= s1) & (col < s2)) | (col >= s3)
            # Softplus(beta=10), numerically stable + torch's linear-threshold branch.
            bx = beta * y
            sp = (jnp.maximum(bx, 0.0) + jnp.log(1.0 + jnp.exp(-jnp.abs(bx)))) / beta
            sp = jnp.where(bx > threshold, y, sp)
            out = jnp.where(is_var, sp, out)

        if has_soft:
            is_soft = (col >= s2) & (col < s3)
            # Numerically-stable softmax restricted to the softmax columns.
            z = jnp.where(is_soft, y, -1e30)
            m = jnp.max(z, axis=1, keepdims=True)
            e = jnp.exp(z - m)                      # ~0 for non-softmax columns
            denom = jnp.sum(e, axis=1, keepdims=True)
            sm = e / denom                          # exact divide: feeds a GNLL loss
            out = jnp.where(is_soft, sm, out)

        o_ref[...] = out

    return kernel


# --------------------------- Parameter preparation --------------------------- #

def prepare_pals_params(params, idx, operand_dtype=jnp.bfloat16):
    """Do the (tiny) w3/b3 column permutation and operand dtype casts ONCE, not per call."""
    (w1, b1), (w2, b2), (w3, b3) = params
    normal_idx, normal_var_idx, softmax_idx, softmax_var_idx = idx
    perm = jnp.asarray(list(normal_idx) + list(normal_var_idx)
                       + list(softmax_idx) + list(softmax_var_idx), jnp.int32)
    assert perm.shape[0] == w3.shape[1]
    splits = (len(normal_idx), len(normal_var_idx), len(softmax_idx), len(softmax_var_idx))
    return PreparedParams(
        w1=w1.astype(operand_dtype), b1=b1.astype(jnp.float32),
        w2=w2.astype(operand_dtype), b2=b2.astype(jnp.float32),
        w3=w3[:, perm].astype(operand_dtype), b3=b3[:, perm].astype(jnp.float32),
        splits=splits)


# ------------------------------ Host wrapper -------------------------------- #

def pals_gnll_forward(x, prepared, *, tile_b_max=4096):
    """Full PALS_GNLL.forward as one fused pallas_call.

    x: (B, D_in) float
    prepared: PreparedParams from prepare_pals_params()
    """
    w1, b1, w2, b2, w3p, b3p = (prepared.w1, prepared.b1, prepared.w2,
                                prepared.b2, prepared.w3, prepared.b3)
    n_norm, n_nvar, n_soft, n_svar = prepared.splits
    d_out = w3p.shape[1]
    assert n_norm + n_nvar + n_soft + n_svar == d_out

    op_dtype = w1.dtype
    op_bytes = np.dtype(op_dtype).itemsize
    B, d_in = x.shape
    h1w, h2w = w1.shape[1], w2.shape[1]
    x = x.astype(op_dtype)

    # --- generation-aware VMEM budget (v5e/v6e: 128 MiB phys, v7x: 64 MiB) ---
    try:
        physical_vmem = int(pltpu.get_tpu_info().vmem_capacity_bytes)
    except Exception:
        physical_vmem = 64 << 20                     # conservative fallback (v7x-sized)
    vmem_budget = min((physical_vmem * 3) // 4, 64 << 20)   # v7x ~48 MiB, v5e/v6e 64 MiB

    # Per-row VMEM estimate (everything pads to 128 lanes).
    per_row = (2 * _pad_lanes(d_in) * op_bytes                    # x block (double buffered)
               + 2 * _pad_lanes(d_out) * 4                        # out block (double buffered)
               + (_pad_lanes(h1w) + _pad_lanes(h2w)) * (4 + op_bytes)  # h1/h2 f32 + casts
               + 5 * _pad_lanes(d_out) * 4)                       # y, sp, z, e, out temps
    per_row += per_row // 4                                       # 25% headroom
    weight_bytes = 2 * sum(
        _round_up(a.shape[0], 8) * _pad_lanes(a.shape[1]) * np.dtype(a.dtype).itemsize
        for a in (w1, b1, w2, b2, w3p, b3p))
    cap = ((vmem_budget - weight_bytes - (1 << 20)) // per_row) // 8 * 8
    tile_cap = max(min(tile_b_max, cap), 8)

    # --- balanced batch tiling; keep >=2 steps when possible (v7x: both TCs) ---
    min_steps = 2 if B >= 16 else 1
    num_tiles = max(pl.cdiv(B, tile_cap), min_steps)
    tile_b = _round_up(pl.cdiv(B, num_tiles), 8)
    num_tiles = pl.cdiv(B, tile_b)
    b_pad = num_tiles * tile_b
    if b_pad != B:
        x = jnp.pad(x, ((0, b_pad - B), (0, 0)))
    grid = (num_tiles,)

    kernel = _make_pals_gnll_kernel(n_norm, n_nvar, n_soft, n_svar, op_dtype)
    const = lambda i: (0, 0)                          # weights/biases stay VMEM-resident

    cost = pl.CostEstimate(
        flops=2 * b_pad * (d_in * h1w + h1w * h2w + h2w * d_out),
        transcendentals=b_pad * (2 * (n_nvar + n_svar) + n_soft),
        bytes_accessed=b_pad * (d_in * op_bytes + d_out * 4)
                       + sum(int(a.size) * np.dtype(a.dtype).itemsize
                             for a in (w1, b1, w2, b2, w3p, b3p)))

    y = pl.pallas_call(
        kernel,
        out_shape=jax.ShapeDtypeStruct((b_pad, d_out), jnp.float32),
        grid=grid,
        in_specs=[
            pl.BlockSpec((tile_b, d_in), lambda i: (i, 0)),
            pl.BlockSpec(w1.shape, const), pl.BlockSpec(b1.shape, const),
            pl.BlockSpec(w2.shape, const), pl.BlockSpec(b2.shape, const),
            pl.BlockSpec(w3p.shape, const), pl.BlockSpec(b3p.shape, const),
        ],
        out_specs=pl.BlockSpec((tile_b, d_out), lambda i: (i, 0)),
        compiler_params=pltpu.CompilerParams(
            dimension_semantics=("parallel",),
            vmem_limit_bytes=int(vmem_budget)),
        cost_estimate=cost,
    )(x, w1, b1, w2, b2, w3p, b3p)

    y = y[:B]
    s1, s2, s3 = n_norm, n_norm + n_nvar, n_norm + n_nvar + n_soft
    return PALS_output(
        normal=MeanAndVar(mean=y[:, :s1], var=y[:, s1:s2]),
        softmax=MeanAndVar(mean=y[:, s2:s3], var=y[:, s3:]),
    )


# ----------------------------- Parameter setup ------------------------------ #

def init_linear(key, fan_in, fan_out):
    """Deterministic torch.nn.Linear-style init: U(-1/sqrt(fan_in), 1/sqrt(fan_in))."""
    kw, kb = jax.random.split(key)
    bound = 1.0 / jnp.sqrt(jnp.float32(fan_in))
    w = jax.random.uniform(kw, (fan_in, fan_out), jnp.float32, -bound, bound)
    b = jax.random.uniform(kb, (1, fan_out), jnp.float32, -bound, bound)
    return w, b


# -------------------------------- Reference ---------------------------------- #

def _reference(x, params, idx, op_dtype):
    """Pure-JAX PALS_GNLL.forward with the SAME operand dtype / f32 accumulation."""
    (w1, b1), (w2, b2), (w3, b3) = params
    f32 = jnp.float32
    h1 = jnp.maximum(jnp.dot(x.astype(op_dtype), w1.astype(op_dtype),
                             preferred_element_type=f32) + b1, 0.0)
    h2 = jnp.maximum(jnp.dot(h1.astype(op_dtype), w2.astype(op_dtype),
                             preferred_element_type=f32) + b2, 0.0)
    y = jnp.dot(h2.astype(op_dtype), w3.astype(op_dtype),
                preferred_element_type=f32) + b3
    return PALS_output(
        normal=MeanAndVar(mean=y[:, jnp.asarray(idx[0])],
                          var=_softplus(y[:, jnp.asarray(idx[1])])),
        softmax=MeanAndVar(mean=jax.nn.softmax(y[:, jnp.asarray(idx[2])], axis=1),
                           var=_softplus(y[:, jnp.asarray(idx[3])])))


def _check(out, ref, atol, rtol):
    assert jnp.allclose(out.normal.mean, ref.normal.mean, atol=atol, rtol=rtol)
    assert jnp.allclose(out.normal.var, ref.normal.var, atol=atol, rtol=rtol)
    assert jnp.allclose(out.softmax.mean, ref.softmax.mean, atol=atol, rtol=rtol)
    assert jnp.allclose(out.softmax.var, ref.softmax.var, atol=atol, rtol=rtol)


# ---------------------------------- Main ------------------------------------ #

if __name__ == "__main__":
    key = jax.random.PRNGKey(0)

    # ---- test 1: small shapes matching the module spec, single grid step ----
    k_x, k_l1, k_l2, k_l3, key = jax.random.split(key, 5)
    B, D_IN, HID, D_OUT = 8, 32, 32, 8
    idx = [[0, 1], [2, 3], [4, 5], [6, 7]]      # [normal, normal_var, softmax, softmax_var]

    x = jax.random.normal(k_x, (B, D_IN), jnp.float32)
    params = (init_linear(k_l1, D_IN, HID),
              init_linear(k_l2, HID, HID),
              init_linear(k_l3, HID, D_OUT))
    prepared = prepare_pals_params(params, idx)            # bf16 operands by default
    out = pals_gnll_forward(x, prepared)
    jax.block_until_ready(out.normal.mean)

    assert out.normal.mean.shape == (B, 2) and out.normal.var.shape == (B, 2)
    assert out.softmax.mean.shape == (B, 2) and out.softmax.var.shape == (B, 2)
    # Tight check vs. a dtype-matched (bf16 operand, f32 accum) reference.
    _check(out, _reference(x, params, idx, jnp.bfloat16), atol=2e-3, rtol=2e-3)
    # Loose semantic check vs. the pure-f32 PyTorch-equivalent reference.
    _check(out, _reference(x, params, idx, jnp.float32), atol=5e-2, rtol=5e-2)

    # ---- test 2: scrambled idx, padded batch, multi-step parallel grid ----
    k_x, k_l1, k_l2, k_l3, key = jax.random.split(key, 5)
    B2, D_IN2, HID2, D_OUT2 = 1030, 48, 64, 12
    idx2 = [[0, 5], [3, 7], [1, 2, 9, 11], [4, 6, 8, 10]]

    x2 = jax.random.normal(k_x, (B2, D_IN2), jnp.float32)
    params2 = (init_linear(k_l1, D_IN2, HID2),
               init_linear(k_l2, HID2, HID2),
               init_linear(k_l3, HID2, D_OUT2))
    prepared2 = prepare_pals_params(params2, idx2)
    out2 = pals_gnll_forward(x2, prepared2)
    jax.block_until_ready(out2.normal.mean)

    assert out2.normal.mean.shape == (B2, 2) and out2.softmax.mean.shape == (B2, 4)
    _check(out2, _reference(x2, params2, idx2, jnp.bfloat16), atol=2e-3, rtol=2e-3)
    _check(out2, _reference(x2, params2, idx2, jnp.float32), atol=5e-2, rtol=5e-2)

    print("KERNEL_OK")
</pallas_src>

<mosaic_0001>
module attributes {stable_mosaic.version = 11 : i64} {
  func.func @kernel(%arg0: i32, %arg1: memref<8x32xbf16, #tpu.memory_space<vmem>>, %arg2: memref<32x32xbf16, #tpu.memory_space<vmem>>, %arg3: memref<1x32xf32, #tpu.memory_space<vmem>>, %arg4: memref<32x32xbf16, #tpu.memory_space<vmem>>, %arg5: memref<1x32xf32, #tpu.memory_space<vmem>>, %arg6: memref<32x8xbf16, #tpu.memory_space<vmem>>, %arg7: memref<1x8xf32, #tpu.memory_space<vmem>>, %arg8: memref<8x8xf32, #tpu.memory_space<vmem>>) attributes {dimension_semantics = [#tpu.dimension_semantics<parallel>], iteration_bounds = array<i64: 1>, scalar_prefetch = 0 : i64, scratch_operands = 0 : i64, tpu.core_type = #tpu.core_type<tc>, window_params = [{transform_indices = @transform_0, window_bounds = array<i64: 8, 32>}, {pipeline_mode = #tpu.pipeline_mode<synchronous>, transform_indices = @transform_1, window_bounds = array<i64: 32, 32>}, {pipeline_mode = #tpu.pipeline_mode<synchronous>, transform_indices = @transform_2, window_bounds = array<i64: 1, 32>}, {pipeline_mode = #tpu.pipeline_mode<synchronous>, transform_indices = @transform_3, window_bounds = array<i64: 32, 32>}, {pipeline_mode = #tpu.pipeline_mode<synchronous>, transform_indices = @transform_4, window_bounds = array<i64: 1, 32>}, {pipeline_mode = #tpu.pipeline_mode<synchronous>, transform_indices = @transform_5, window_bounds = array<i64: 32, 8>}, {pipeline_mode = #tpu.pipeline_mode<synchronous>, transform_indices = @transform_6, window_bounds = array<i64: 1, 8>}, {transform_indices = @transform_7, window_bounds = array<i64: 8, 8>}]} {
    %c0 = arith.constant 0 : index
    %c0_0 = arith.constant 0 : index
    %0 = vector.load %arg1[%c0, %c0_0] : memref<8x32xbf16, #tpu.memory_space<vmem>>, vector<8x32xbf16>
    %c0_1 = arith.constant 0 : index
    %c0_2 = arith.constant 0 : index
    %1 = vector.load %arg2[%c0_1, %c0_2] : memref<32x32xbf16, #tpu.memory_space<vmem>>, vector<32x32xbf16>
    %cst = arith.constant dense<0.000000e+00> : vector<8x32xf32>
    %2 = tpu.matmul %0, %1, %cst {dimension_numbers = #tpu.dot_dimension_numbers<[1], [0], [0], [1], [0, 0, 1, 1], [], []>} : vector<8x32xbf16>, vector<32x32xbf16>, vector<8x32xf32> -> vector<8x32xf32>
    %c0_3 = arith.constant 0 : index
    %c0_4 = arith.constant 0 : index
    %3 = vector.load %arg3[%c0_3, %c0_4] : memref<1x32xf32, #tpu.memory_space<vmem>>, vector<1x32xf32>
    %4 = vector.broadcast %3 : vector<1x32xf32> to vector<8x32xf32>
    %5 = arith.addf %2, %4 : vector<8x32xf32>
    %cst_5 = arith.constant 0.000000e+00 : f32
    %6 = vector.broadcast %cst_5 : f32 to vector<8x32xf32>
    %7 = arith.maximumf %5, %6 : vector<8x32xf32>
    %8 = arith.truncf %7 : vector<8x32xf32> to vector<8x32xbf16>
    %c0_6 = arith.constant 0 : index
    %c0_7 = arith.constant 0 : index
    %9 = vector.load %arg4[%c0_6, %c0_7] : memref<32x32xbf16, #tpu.memory_space<vmem>>, vector<32x32xbf16>
    %cst_8 = arith.constant dense<0.000000e+00> : vector<8x32xf32>
    %10 = tpu.matmul %8, %9, %cst_8 {dimension_numbers = #tpu.dot_dimension_numbers<[1], [0], [0], [1], [0, 0, 1, 1], [], []>} : vector<8x32xbf16>, vector<32x32xbf16>, vector<8x32xf32> -> vector<8x32xf32>
    %c0_9 = arith.constant 0 : index
    %c0_10 = arith.constant 0 : index
    %11 = vector.load %arg5[%c0_9, %c0_10] : memref<1x32xf32, #tpu.memory_space<vmem>>, vector<1x32xf32>
    %12 = vector.broadcast %11 : vector<1x32xf32> to vector<8x32xf32>
    %13 = arith.addf %10, %12 : vector<8x32xf32>
    %cst_11 = arith.constant 0.000000e+00 : f32
    %14 = vector.broadcast %cst_11 : f32 to vector<8x32xf32>
    %15 = arith.maximumf %13, %14 : vector<8x32xf32>
    %16 = arith.truncf %15 : vector<8x32xf32> to vector<8x32xbf16>
    %c0_12 = arith.constant 0 : index
    %c0_13 = arith.constant 0 : index
    %17 = vector.load %arg6[%c0_12, %c0_13] : memref<32x8xbf16, #tpu.memory_space<vmem>>, vector<32x8xbf16>
    %cst_14 = arith.constant dense<0.000000e+00> : vector<8x8xf32>
    %18 = tpu.matmul %16, %17, %cst_14 {dimension_numbers = #tpu.dot_dimension_numbers<[1], [0], [0], [1], [0, 0, 1, 1], [], []>} : vector<8x32xbf16>, vector<32x8xbf16>, vector<8x8xf32> -> vector<8x8xf32>
    %c0_15 = arith.constant 0 : index
    %c0_16 = arith.constant 0 : index
    %19 = vector.load %arg7[%c0_15, %c0_16] : memref<1x8xf32, #tpu.memory_space<vmem>>, vector<1x8xf32>
    %20 = vector.broadcast %19 : vector<1x8xf32> to vector<8x8xf32>
    %21 = arith.addf %18, %20 : vector<8x8xf32>
    %22 = tpu.iota {dimensions = array<i32: 1>} : vector<1x8xi32>
    %c2_i32 = arith.constant 2 : i32
    %23 = vector.broadcast %c2_i32 : i32 to vector<1x8xi32>
    %24 = arith.cmpi sge, %22, %23 : vector<1x8xi32>
    %c4_i32 = arith.constant 4 : i32
    %25 = vector.broadcast %c4_i32 : i32 to vector<1x8xi32>
    %26 = arith.cmpi slt, %22, %25 : vector<1x8xi32>
    %27 = arith.andi %24, %26 : vector<1x8xi1>
    %c6_i32 = arith.constant 6 : i32
    %28 = vector.broadcast %c6_i32 : i32 to vector<1x8xi32>
    %29 = arith.cmpi sge, %22, %28 : vector<1x8xi32>
    %30 = arith.ori %27, %29 : vector<1x8xi1>
    %cst_17 = arith.constant 1.000000e+01 : f32
    %31 = vector.broadcast %cst_17 : f32 to vector<8x8xf32>
    %32 = arith.mulf %31, %21 : vector<8x8xf32>
    %cst_18 = arith.constant 0.000000e+00 : f32
    %33 = vector.broadcast %cst_18 : f32 to vector<8x8xf32>
    %34 = arith.maximumf %32, %33 : vector<8x8xf32>
    %35 = math.absf %32 : vector<8x8xf32>
    %cst_19 = arith.constant 0.000000e+00 : f32
    %36 = vector.broadcast %cst_19 : f32 to vector<8x8xf32>
    %37 = arith.subf %36, %35 : vector<8x8xf32>
    %38 = math.exp %37 : vector<8x8xf32>
    %cst_20 = arith.constant 1.000000e+00 : f32
    %39 = vector.broadcast %cst_20 : f32 to vector<8x8xf32>
    %40 = arith.addf %39, %38 : vector<8x8xf32>
    %41 = math.log %40 : vector<8x8xf32>
    %42 = arith.addf %34, %41 : vector<8x8xf32>
    %cst_21 = arith.constant 1.000000e+01 : f32
    %43 = vector.broadcast %cst_21 : f32 to vector<8x8xf32>
    %44 = arith.divf %42, %43 : vector<8x8xf32>
    %cst_22 = arith.constant 2.000000e+01 : f32
    %45 = vector.broadcast %cst_22 : f32 to vector<8x8xf32>
    %46 = arith.cmpf ogt, %32, %45 : vector<8x8xf32>
    %47 = arith.select %46, %21, %44 : vector<8x8xi1>, vector<8x8xf32>
    %48 = vector.shape_cast %30 : vector<1x8xi1> to vector<1x8xi1>
    %49 = vector.broadcast %48 : vector<1x8xi1> to vector<8x8xi1>
    %50 = arith.select %49, %47, %21 : vector<8x8xi1>, vector<8x8xf32>
    %c4_i32_23 = arith.constant 4 : i32
    %51 = vector.broadcast %c4_i32_23 : i32 to vector<1x8xi32>
    %52 = arith.cmpi sge, %22, %51 : vector<1x8xi32>
    %c6_i32_24 = arith.constant 6 : i32
    %53 = vector.broadcast %c6_i32_24 : i32 to vector<1x8xi32>
    %54 = arith.cmpi slt, %22, %53 : vector<1x8xi32>
    %55 = arith.andi %52, %54 : vector<1x8xi1>
    %cst_25 = arith.constant -1.000000e+30 : f32
    %56 = vector.shape_cast %55 : vector<1x8xi1> to vector<1x8xi1>
    %57 = vector.broadcast %56 : vector<1x8xi1> to vector<8x8xi1>
    %58 = vector.broadcast %cst_25 : f32 to vector<8x8xf32>
    %59 = arith.select %57, %21, %58 : vector<8x8xi1>, vector<8x8xf32>
    %cst_26 = arith.constant dense<0xFF800000> : vector<8xf32>
    %60 = vector.multi_reduction <maximumf>, %59, %cst_26 [1] : vector<8x8xf32> to vector<8xf32>
    %61 = vector.shape_cast %60 : vector<8xf32> to vector<8x1xf32>
    %62 = vector.broadcast %61 : vector<8x1xf32> to vector<8x8xf32>
    %63 = arith.subf %59, %62 : vector<8x8xf32>
    %64 = math.exp %63 : vector<8x8xf32>
    %cst_27 = arith.constant dense<0.000000e+00> : vector<8xf32>
    %65 = vector.multi_reduction <add>, %64, %cst_27 [1] : vector<8x8xf32> to vector<8xf32>
    %66 = vector.shape_cast %65 : vector<8xf32> to vector<8x1xf32>
    %67 = vector.broadcast %66 : vector<8x1xf32> to vector<8x8xf32>
    %68 = arith.divf %64, %67 : vector<8x8xf32>
    %69 = vector.shape_cast %55 : vector<1x8xi1> to vector<1x8xi1>
    %70 = vector.broadcast %69 : vector<1x8xi1> to vector<8x8xi1>
    %71 = arith.select %70, %68, %50 : vector<8x8xi1>, vector<8x8xf32>
    %c0_28 = arith.constant 0 : index
    %c0_29 = arith.constant 0 : index
    %72 = vector.load %arg8[%c0_28, %c0_29] : memref<8x8xf32, #tpu.memory_space<vmem>>, vector<8x8xf32>
    tpu.vector_store %arg8[%c0_28, %c0_29], %71 {strides = array<i32>} : memref<8x8xf32, #tpu.memory_space<vmem>>, vector<8x8xf32>,
    return
  }
  func.func @transform_0(%arg0: i32) -> (i32, i32) {
    %c0_i32 = arith.constant 0 : i32
    %c0_i32_0 = arith.constant 0 : i32
    return %arg0, %c0_i32 : i32, i32
  }
  func.func @transform_1(%arg0: i32) -> (i32, i32) {
    %c0_i32 = arith.constant 0 : i32
    %c0_i32_0 = arith.constant 0 : i32
    %c0_i32_1 = arith.constant 0 : i32
    return %c0_i32, %c0_i32_0 : i32, i32
  }
  func.func @transform_2(%arg0: i32) -> (i32, i32) {
    %c0_i32 = arith.constant 0 : i32
    %c0_i32_0 = arith.constant 0 : i32
    %c0_i32_1 = arith.constant 0 : i32
    return %c0_i32, %c0_i32_0 : i32, i32
  }
  func.func @transform_3(%arg0: i32) -> (i32, i32) {
    %c0_i32 = arith.constant 0 : i32
    %c0_i32_0 = arith.constant 0 : i32
    %c0_i32_1 = arith.constant 0 : i32
    return %c0_i32, %c0_i32_0 : i32, i32
  }
  func.func @transform_4(%arg0: i32) -> (i32, i32) {
    %c0_i32 = arith.constant 0 : i32
    %c0_i32_0 = arith.constant 0 : i32
    %c0_i32_1 = arith.constant 0 : i32
    return %c0_i32, %c0_i32_0 : i32, i32
  }
  func.func @transform_5(%arg0: i32) -> (i32, i32) {
    %c0_i32 = arith.constant 0 : i32
    %c0_i32_0 = arith.constant 0 : i32
    %c0_i32_1 = arith.constant 0 : i32
    return %c0_i32, %c0_i32_0 : i32, i32
  }
  func.func @transform_6(%arg0: i32) -> (i32, i32) {
    %c0_i32 = arith.constant 0 : i32
    %c0_i32_0 = arith.constant 0 : i32
    %c0_i32_1 = arith.constant 0 : i32
    return %c0_i32, %c0_i32_0 : i32, i32
  }
  func.func @transform_7(%arg0: i32) -> (i32, i32) {
    %c0_i32 = arith.constant 0 : i32
    %c0_i32_0 = arith.constant 0 : i32
    return %arg0, %c0_i32 : i32, i32
  }
}

</mosaic_0001>

<bundles_post_ra>
// kernel: tpu_custom_call.1
= control target key start
LH: loop header
LB: loop body
LE: loop exit
PB: predicated region body
PF: predicated region fallthrough
CT: control target
= control target key end

     0   :  { %12 = vsyncpa [#allocation3], 0  ;;  %s524_s0 = inlined_call_operand.vmem [shape: bf16[8,32], index: 0, kind: input, shape index: {}]   ;;  %s525_s1 = inlined_call_operand.vmem [shape: bf16[32,32], index: 1, kind: input, shape index: {}]   ;;  %s526_s2 = inlined_call_operand.hbm [shape: f32[1,32], index: 2, kind: input, shape index: {}]   ;;  %s527_s3 = inlined_call_operand.hbm [shape: bf16[32,32], index: 3, kind: input, shape index: {}]   ;;  %s528_s4 = inlined_call_operand.hbm [shape: f32[1,32], index: 4, kind: input, shape index: {}]   ;;  %s529_s5 = inlined_call_operand.vmem [shape: bf16[32,8], index: 5, kind: input, shape index: {}]   ;;  %s530_s6 = inlined_call_operand.vmem [shape: f32[1,8], index: 6, kind: input, shape index: {}]   ;;  %s531_s7 = inlined_call_operand.hbm [shape: f32[8,8], index: 7, kind: output, shape index: {}]  }
   0x1   :  { %13 = vsyncpa [#allocation6], 0  ;;  %s34_s26 = sshll.u32 %s527_s3, 4  ;;  %s35_s26 = int_to_ptr.hbm [resolvable:$true] %s34_s26 }
   0x2   :  { %14 = vsyncpa [#allocation4], 0  ;;  %s421_s27 = smov [#allocation5]   ;;  %s24_s8 = sshll.u32 %s526_s2, 4  ;;  %s25_s8 = int_to_ptr.hbm [resolvable:$true] %s24_s8 }
   0x3   :  { %s36_s28 = sshll.u32 %s421_s27, 4  ;;  %s422_s9 = smov 64   ;;  %s37_s28 = int_to_ptr.vmem [resolvable:$true] %s36_s28 }
   0x4   :  { %s423_s10 = smov 4   ;;  %s424_s11 = smov [#allocation2]  }
   0x5   :  { %42 = dma.hbm_to_vmem [thread:$0]  %s35_s26, 256, %s37_s28, [#allocation6], %s422_s9, %s422_s9, %s423_s10  }
   0x6   :  { %s26_s12 = sshll.u32 %s424_s11, 4  ;;  %s48_s15 = sshll.u32 %s528_s4, 4  ;;  %s27_s12 = int_to_ptr.vmem [resolvable:$true] %s26_s12  ;;  %s49_s15 = int_to_ptr.hbm [resolvable:$true] %s48_s15 }
   0x7   :  { %29 = dma.hbm_to_vmem [thread:$0]  %s25_s8, 16, %s27_s12, [#allocation3]  }
   0x8   :  { %s425_s3 = smov [#allocation7]  }
   0x9   :  { %s50_s16 = sshll.u32 %s425_s3, 4  ;;  %s51_s16 = int_to_ptr.vmem [resolvable:$true] %s50_s16 }
   0xa   :  { %53 = dma.hbm_to_vmem [thread:$0]  %s49_s15, 16, %s51_s16, [#allocation6]  }
   0xb   :  { %415 = dma.done.wait [#allocation3], 16  }
   0xc   :  { %416 = vsyncadd [#allocation3], 4294967280 }
   0xd   :  { %417 = dma.done.wait [#allocation6], 272  }
   0xe   :  { %418 = vsyncadd [#allocation6], 4294967024  ;;  %v294_v0 = vld [vmem:[%s525_s1 + $0x8] sm:$0xff]  ;;  %v293_v1 = vld [vmem:[%s525_s1] sm:$0xff]  ;;  %vm92_vm0 = vcmask 261120   ;;  %v185_v19 = vlaneseq  ;;  %vm221_vm4 = vcmask 64512  }
   0xf   :  { %102 = vmatpush.bf16.msra.mxu0 %v294_v0  ;;  %v71_v2 = vld [vmem:[%s524_s0] sm:$0xf]  ;;  %v296_v3 = vld [vmem:[#allocation5 + $0x8] sm:$0xff]  ;;  %v307_v13 = vld [vmem:[#allocation7] ss:$0 sm:$0xff]  ;;  %v426_v26 = vmov 10.0  }
  0x10   :  { %140 = vmatpush.bf16.msra.mxu1 %v296_v3  ;;  %v295_v4 = vld [vmem:[#allocation5] sm:$0xff]  ;;  %v306_v5 = vld [vmem:[#allocation2] ss:$0 sm:$0xff]  ;;  %v186_v20 = vand.u32 127, %v185_v19  ;;  %309 = vrcp.f32 %v426_v26  ;;  %s255_s27 = sshll.u32 %s531_s7, 4  ;;  %s256_s27 = int_to_ptr.hbm [resolvable:$true] %s255_s27 }
  0x11   :  { %v298_v11 = vld [vmem:[%s529_s5 + $0x8] sm:$0xff]  ;;  %v297_v12 = vld [vmem:[%s529_s5] sm:$0xff]  ;;  %s427_s5 = smov [#allocation8]  }
  0x12   :  { %178 = vmatpush.bf16.msra.mxu2 %v298_v11  ;;  %v308_v21 = vld [vmem:[%s530_s6] ss:$0 sm:$0xff]  ;;  %vm215_vm1 = vcmp.ge.s32.totalorder %v186_v20, 4  ;;  %vm216_vm2 = vcmp.lt.s32.totalorder %v186_v20, 6  ;;  %vm187_vm6 = vcmp.ge.s32.totalorder %v186_v20, 2  ;;  %vm188_vm7 = vcmp.lt.s32.totalorder %v186_v20, 4 }
  0x13   :  { %103 = vmatpush.bf16.msra.mxu0 %v293_v1  ;;  %vm498_vm3 = vmand %vm215_vm1, %vm216_vm2  ;;  %vm190_vm9 = vcmp.ge.s32.totalorder %v186_v20, 6  ;;  %s253_s6 = sshll.u32 %s427_s5, 4  ;;  %s254_s6 = int_to_ptr.vmem [resolvable:$true] %s253_s6 }
  0x14   :  { %141 = vmatpush.bf16.msra.mxu1 %v295_v4  ;;  %vm189_vm8 = vmand %vm187_vm6, %vm188_vm7 }
  0x15   :  { %vm509_vm10 = vmor %vm189_vm8, %vm190_vm9 }
  0x16   :  { %274 = vmatmul.msk.bf16.vlgmr.msra.gmra.mxu0 %vm92_vm0, %v71_v2  ;;  %179 = vmatpush.bf16.msra.mxu2 %v297_v12  ;;  %v310_v32 = vpop.eup %309 }
  0x17   :  { %v203_v34 = vmul.f32 10.0, %v310_v32  ;;  %vm207_vm5 = vweird.f32 %v310_v32 }
  0x19   :  { %v204_v35 = vsub.f32 1.0, %v203_v34 }
  0x1b   :  { %v205_v38 = vmul.f32 %v310_v32, %v204_v35 }
  0x1d   :  { %v206_v39 = vadd.f32 %v310_v32, %v205_v38 }
  0x1f   :  { %v208_v43 = vsel %vm207_vm5, %v310_v32, %v206_v39 }
  0x93   :  { %v105_v6 = vpop.f32.mrf.mxu0 }
  0x94   :  { %v106_v7 = vadd.f32 %v306_v5, %v105_v6 }
  0x96   :  { %v109_v8 = vmax.f32 %v106_v7, 0.0 }
  0x98   :  { %v110_v9 = vpack.c.bf16 %v109_v8, %v109_v8 }
  0x9a   :  { %283 = vmatmul.msk.bf16.vlgmr.msra.gmra.mxu1 %vm92_vm0, %v110_v9 }
  0x9b   :  { %v107_v10 = vpop.f32.mrf.mxu0 }
 0x117   :  { %v143_v14 = vpop.f32.mrf.mxu1 }
 0x118   :  { %v144_v15 = vadd.f32 %v307_v13, %v143_v14 }
 0x11a   :  { %v147_v16 = vmax.f32 %v144_v15, 0.0 }
 0x11c   :  { %v148_v17 = vpack.c.bf16 %v147_v16, %v147_v16 }
 0x11e   :  { %292 = vmatmul.msk.bf16.vlgmr.msra.gmra.mxu2 %vm92_vm0, %v148_v17 }
 0x11f   :  { %v145_v18 = vpop.f32.mrf.mxu1 }
 0x1a1   :  { %v181_v22 = vpop.f32.mrf.mxu2 }
 0x1a2   :  { %v502_v24 = vadd.f32 %v308_v21, %v181_v22 }
 0x1a4   :  { %v192_v25 = vmul.f32 10.0, %v502_v24  ;;  %v220_v27 = vsel %vm498_vm3, %v502_v24, -1e+30 }
 0x1a5   :  { %v222_v28 = vsel %vm221_vm4, %v220_v27, -inf }
 0x1a6   :  { %v194_v29 = vand.u32 2147483647, %v192_v25  ;;  %223 = vmax.xlane.f32.xlu0 %v222_v28  ;;  %v193_v41 = vmax.f32 %v192_v25, 0.0  ;;  %vm210_vm11 = vcmp.gt.f32.partialorder %v192_v25, 20.0 }
 0x1a8   :  { %v195_v30 = vsub.f32 0.0, %v194_v29 }
 0x1a9   :  { %v183_v31 = vpop.f32.mrf.mxu2 }
 0x1aa   :  { %v196_v33 = vmul.f32 1.442695, %v195_v30 }
 0x1ac   :  { %311 = vpow2.f32 %v196_v33 }
 0x1b2   :  { %v312_v36 = vpop.eup %311 }
 0x1b3   :  { %v198_v37 = vadd.f32 1.0, %v312_v36 }
 0x1b5   :  { %313 = vlog2.f32 %v198_v37 }
 0x1bb   :  { %v314_v40 = vpop.eup %313 }
 0x1bc   :  { %v200_v42 = vmul.f32 0.6931472, %v314_v40 }
 0x1be   :  { %v201_v44 = vadd.f32 %v200_v42, %v193_v41 }
 0x1c0   :  { %v209_v45 = vmul.f32 %v208_v43, %v201_v44 }
 0x1c2   :  { %v211_v47 = vsel %vm210_vm11, %v502_v24, %v209_v45 }
 0x1c3   :  { %v214_v48 = vsel %vm509_vm10, %v211_v47, %v502_v24 }
 0x219   :  { %v224_v49 = vpop.xlane.xlu0 %223 }
 0x21a   :  { %v225_v50 = vsub.f32 %v220_v27, %v224_v49 }
 0x21c   :  { %v226_v51 = vmul.f32 1.442695, %v225_v50 }
 0x21e   :  { %315 = vpow2.f32 %v226_v51 }
 0x224   :  { %v316_v52 = vpop.eup %315 }
 0x225   :  { %v228_v53 = vsel %vm221_vm4, %v316_v52, 0.0 }
 0x226   :  { %229 = vadd.xlane.f32.xlu0 %v228_v53 }
 0x299   :  { %v230_v54 = vpop.xlane.xlu0 %229 }
 0x29a   :  { %317 = vrcp.f32 %v230_v54  ;;  %v242_v58 = vand.u32 2147483648, %v230_v54  ;;  %v240_v60 = vand.u32 2147483647, %v230_v54  ;;  %vm236_vm13 = vweird.f32 %v230_v54 }
 0x29c   :  { %v243_v62 = vor.u32 1.1754944e-38, %v242_v58  ;;  %vm241_vm15 = vcmp.eq.f32.partialorder %v240_v60, 8.507059e+37 }
 0x2a0   :  { %v318_v55 = vpop.eup %317 }
 0x2a1   :  { %v232_v56 = vmul.f32 %v318_v55, %v230_v54  ;;  %vm237_vm12 = vweird.f32 %v318_v55 }
 0x2a2   :  { %vm238_vm14 = vmor %vm236_vm13, %vm237_vm12 }
 0x2a3   :  { %v233_v57 = vsub.f32 1.0, %v232_v56 }
 0x2a5   :  { %v234_v59 = vmul.f32 %v318_v55, %v233_v57 }
 0x2a7   :  { %v235_v61 = vadd.f32 %v318_v55, %v234_v59 }
 0x2a9   :  { %v239_v63 = vsel %vm238_vm14, %v318_v55, %v235_v61 }
 0x2aa   :  { %v244_v0 = vsel %vm241_vm15, %v243_v62, %v239_v63 }
 0x2ab   :  { %v245_v1 = vmul.f32 %v316_v52, %v244_v0 }
 0x2ad   :  { %v246_v2 = vsel %vm498_vm3, %v245_v1, %v214_v48 }
 0x2ae   :  { %247 = vst.msk [vmem:[#allocation8] sm:$0xff] %vm221_vm4, %v246_v2 }
 0x2af   :  { %258 = dma.vmem_to_hbm [thread:$0]  %s254_s6, 128, %s256_s27, [#allocation4]  }
 0x2b0   :  { %419 = dma.done.wait [#allocation4], 128  }
 0x2b1   :  { %420 = vsyncadd [#allocation4], 4294967168 }
 0x2b2   :  { %263 = vsyncpa [#allocation3], 1 }
 0x2b3   :  { %264 = vsyncpa [#allocation6], 1 }
 0x2b4   :  { %265 = vsyncpa [#allocation4], 1 }

</bundles_post_ra>
